<compile_context>
chip_gen: v7x
topology: tpu7x:2x2x1
jax: 0.10.0
libtpu: 0.0.40
codegen_flags: <defaults>
</compile_context>

<pallas_src>
import jax
import jax.numpy as jnp
from jax.experimental import pallas as pl
from jax.experimental.pallas import tpu as pltpu

# ----- problem sizes (small, consistent with the wrapped module) -----
N, C_IN, H, W = 2, 4, 16, 16           # input  NCHW
C_OUT, KH, KW = 8, 3, 3                # Conv2d(4, 8, kernel_size=3, padding=1)
PAD = 1
HW = H * W                             # 256 flattened spatial positions (lane dim)
_EDGE = W + PAD                        # 17: flat zero pad; any |tap shift| <= W+1 stays in range


def _conv3x3_kernel(x_ref, w_ref, b_ref, o_ref, xpad_ref):
    """Direct 3x3 same-padding conv, stride 1, NCHW-flat layout.

    x_ref:    [N*C_IN, H*W]            flattened NCHW input  (lane dim = 256)
    w_ref:    [KH*KW, C_OUT, C_IN]     per-tap weight matrices
    b_ref:    [C_OUT, 1]               bias
    o_ref:    [N*C_OUT, H*W]           flattened NCHW output (lane dim = 256)
    xpad_ref: [N*C_IN, H*W + 2*_EDGE]  VMEM scratch: zero-padded flat rows
    """
    # In-kernel zero padding (replaces the XLA transpose + jnp.pad glue):
    # zero the scratch once, then write the interior.  A vertical tap shift of
    # +-W lands in the zero edges, so no vertical mask is needed below.
    xpad_ref[...] = jnp.zeros_like(xpad_ref)
    xpad_ref[:, _EDGE:_EDGE + HW] = x_ref[...]

    # Column (w) coordinate of every flattened output position.  Only the
    # horizontal taps (dx != 0) need masking, to kill row-wraparound columns.
    wcol = jax.lax.broadcasted_iota(jnp.int32, (1, HW), 1) % W
    not_left_edge = wcol >= 1            # valid output columns when dx == -1
    not_right_edge = wcol <= W - 2       # valid output columns when dx == +1

    # Accumulator starts at the broadcast bias (hoisted, shared by both images).
    bias = jnp.broadcast_to(b_ref[...], (C_OUT, HW))

    for n in range(N):                                   # N == 2, fully unrolled
        acc = bias
        for dy in (-1, 0, 1):
            for dx in (-1, 0, 1):
                s = dy * W + dx
                # Shifted window: pure static-offset slice of the padded
                # scratch rows of image n -- no reshape, no relayout.
                window = xpad_ref[n * C_IN:(n + 1) * C_IN,
                                  _EDGE + s:_EDGE + s + HW]       # [C_IN, HW]
                if dx == -1:
                    window = jnp.where(not_left_edge, window, 0.0)
                elif dx == 1:
                    window = jnp.where(not_right_edge, window, 0.0)
                tap = (dy + 1) * KW + (dx + 1)
                acc = acc + jnp.dot(w_ref[tap], window,
                                    preferred_element_type=jnp.float32)
        # Lane-dense (256-wide) unmasked store, already in NCHW row order.
        o_ref[n * C_OUT:(n + 1) * C_OUT, :] = acc.astype(o_ref.dtype)


@jax.jit
def dummy_mixin_forward(x_nchw, weight_oihw, bias):
    """DummyMixin(Conv2d(4, 8, 3, padding=1)).forward(x).

    x_nchw:      [N, C_IN, H, W]       float32 (PyTorch NCHW convention)
    weight_oihw: [C_OUT, C_IN, KH, KW] float32 (PyTorch OIHW convention)
    bias:        [C_OUT]               float32
    returns:     [N, C_OUT, H, W]      float32
    """
    # Free (metadata-only) reshapes; no transposes or pads on the activation.
    x2d = x_nchw.reshape(N * C_IN, HW)
    # Tiny (~1.2 KB) weight re-layout to [tap, C_OUT, C_IN].
    w_taps = jnp.transpose(weight_oihw, (2, 3, 0, 1)).reshape(KH * KW, C_OUT, C_IN)
    b2d = bias.reshape(C_OUT, 1)

    out2d = pl.pallas_call(
        _conv3x3_kernel,
        out_shape=jax.ShapeDtypeStruct((N * C_OUT, HW), jnp.float32),
        in_specs=[
            pl.BlockSpec(memory_space=pltpu.MemorySpace.VMEM),
            pl.BlockSpec(memory_space=pltpu.MemorySpace.VMEM),
            pl.BlockSpec(memory_space=pltpu.MemorySpace.VMEM),
        ],
        out_specs=pl.BlockSpec(memory_space=pltpu.MemorySpace.VMEM),
        scratch_shapes=[pltpu.VMEM((N * C_IN, HW + 2 * _EDGE), jnp.float32)],
    )(x2d, w_taps, b2d)

    # DummyMixin.output_quantizer is nn.Identity() -> no-op.
    return out2d.reshape(N, C_OUT, H, W)                  # free reshape to NCHW


if __name__ == "__main__":
    key = jax.random.PRNGKey(0)
    kx, kw, kb = jax.random.split(key, 3)

    # Deterministic synthetic parameters (Conv2d(4, 8, 3, padding=1) shapes).
    x = jax.random.normal(kx, (N, C_IN, H, W), dtype=jnp.float32)
    fan_in = C_IN * KH * KW
    bound = 1.0 / (fan_in ** 0.5)
    weight = jax.random.uniform(kw, (C_OUT, C_IN, KH, KW),
                                minval=-bound, maxval=bound, dtype=jnp.float32)
    bias = jax.random.uniform(kb, (C_OUT,),
                              minval=-bound, maxval=bound, dtype=jnp.float32)

    out = dummy_mixin_forward(x, weight, bias)
    jax.block_until_ready(out)

    # Sanity check against plain-JAX conv (same semantics as PyTorch Conv2d).
    ref = jax.lax.conv_general_dilated(
        x, weight, window_strides=(1, 1), padding=((PAD, PAD), (PAD, PAD)),
        dimension_numbers=("NCHW", "OIHW", "NCHW")) + bias[None, :, None, None]
    assert out.shape == (N, C_OUT, H, W)
    assert jnp.allclose(out, ref, atol=1e-4, rtol=1e-4)

    print("KERNEL_OK")
</pallas_src>

<mosaic_0001>
module attributes {stable_mosaic.version = 11 : i64} {
  func.func @_conv3x3_kernel(%arg0: memref<8x256xf32, #tpu.memory_space<vmem>>, %arg1: memref<9x8x4xf32, #tpu.memory_space<vmem>>, %arg2: memref<8x1xf32, #tpu.memory_space<vmem>>, %arg3: memref<16x256xf32, #tpu.memory_space<vmem>>, %arg4: memref<8x290xf32, #tpu.memory_space<vmem>>) attributes {dimension_semantics = [], scalar_prefetch = 0 : i64, scratch_operands = 1 : i64, tpu.core_type = #tpu.core_type<tc>} {
    %cst = arith.constant 0.000000e+00 : f32
    %0 = vector.broadcast %cst : f32 to vector<8x290xf32>
    %c0 = arith.constant 0 : index
    %c0_0 = arith.constant 0 : index
    %1 = vector.load %arg4[%c0, %c0_0] : memref<8x290xf32, #tpu.memory_space<vmem>>, vector<8x290xf32>
    tpu.vector_store %arg4[%c0, %c0_0], %0 {strides = array<i32>} : memref<8x290xf32, #tpu.memory_space<vmem>>, vector<8x290xf32>,
    %c0_1 = arith.constant 0 : index
    %c0_2 = arith.constant 0 : index
    %2 = vector.load %arg0[%c0_1, %c0_2] : memref<8x256xf32, #tpu.memory_space<vmem>>, vector<8x256xf32>
    %c0_3 = arith.constant 0 : index
    %c17 = arith.constant 17 : index
    %3 = vector.load %arg4[%c0_3, %c17] : memref<8x290xf32, #tpu.memory_space<vmem>>, vector<8x256xf32>
    tpu.vector_store %arg4[%c0_3, %c17], %2 {strides = array<i32>} : memref<8x290xf32, #tpu.memory_space<vmem>>, vector<8x256xf32>,
    %4 = tpu.iota {dimensions = array<i32: 1>} : vector<1x256xi32>
    %c16_i32 = arith.constant 16 : i32
    %c0_i32 = arith.constant 0 : i32
    %5 = arith.cmpi eq, %c16_i32, %c0_i32 : i32
    %c1_i32 = arith.constant 1 : i32
    %6 = arith.select %5, %c1_i32, %c16_i32 : i32
    %7 = vector.broadcast %6 : i32 to vector<1x256xi32>
    %8 = arith.remsi %4, %7 : vector<1x256xi32>
    %c0_i32_4 = arith.constant 0 : i32
    %9 = vector.broadcast %c0_i32_4 : i32 to vector<1x256xi32>
    %10 = arith.cmpi ne, %8, %9 : vector<1x256xi32>
    %c0_i32_5 = arith.constant 0 : i32
    %11 = vector.broadcast %c0_i32_5 : i32 to vector<1x256xi32>
    %12 = arith.cmpi slt, %8, %11 : vector<1x256xi32>
    %c0_i32_6 = arith.constant 0 : i32
    %13 = arith.cmpi slt, %6, %c0_i32_6 : i32
    %14 = vector.broadcast %13 : i1 to vector<1x256xi1>
    %15 = vector.broadcast %14 : vector<1x256xi1> to vector<1x256xi1>
    %16 = arith.xori %12, %15 : vector<1x256xi1>
    %17 = arith.andi %16, %10 : vector<1x256xi1>
    %18 = vector.broadcast %6 : i32 to vector<1x256xi32>
    %19 = arith.addi %8, %18 : vector<1x256xi32>
    %20 = arith.select %17, %19, %8 : vector<1x256xi1>, vector<1x256xi32>
    %c1_i32_7 = arith.constant 1 : i32
    %21 = vector.broadcast %c1_i32_7 : i32 to vector<1x256xi32>
    %22 = arith.cmpi sge, %20, %21 : vector<1x256xi32>
    %c14_i32 = arith.constant 14 : i32
    %23 = vector.broadcast %c14_i32 : i32 to vector<1x256xi32>
    %24 = arith.cmpi sle, %20, %23 : vector<1x256xi32>
    %c0_8 = arith.constant 0 : index
    %c0_9 = arith.constant 0 : index
    %25 = vector.load %arg2[%c0_8, %c0_9] : memref<8x1xf32, #tpu.memory_space<vmem>>, vector<8x1xf32>
    %26 = vector.shape_cast %25 : vector<8x1xf32> to vector<8x1xf32>
    %27 = vector.broadcast %26 : vector<8x1xf32> to vector<8x256xf32>
    %c0_10 = arith.constant 0 : index
    %c0_11 = arith.constant 0 : index
    %28 = vector.load %arg4[%c0_10, %c0_11] : memref<8x290xf32, #tpu.memory_space<vmem>>, vector<4x256xf32>
    %cst_12 = arith.constant 0.000000e+00 : f32
    %29 = vector.shape_cast %22 : vector<1x256xi1> to vector<1x256xi1>
    %30 = vector.broadcast %29 : vector<1x256xi1> to vector<4x256xi1>
    %31 = vector.broadcast %cst_12 : f32 to vector<4x256xf32>
    %32 = arith.select %30, %28, %31 : vector<4x256xi1>, vector<4x256xf32>
    %c0_13 = arith.constant 0 : index
    %c0_14 = arith.constant 0 : index
    %c0_15 = arith.constant 0 : index
    %33 = vector.load %arg1[%c0_13, %c0_14, %c0_15] : memref<9x8x4xf32, #tpu.memory_space<vmem>>, vector<1x8x4xf32>
    %34 = vector.shape_cast %33 : vector<1x8x4xf32> to vector<8x4xf32>
    %cst_16 = arith.constant dense<0.000000e+00> : vector<8x256xf32>
    %35 = tpu.matmul %34, %32, %cst_16 {dimension_numbers = #tpu.dot_dimension_numbers<[1], [0], [0], [1], [0, 0, 1, 1], [], []>} : vector<8x4xf32>, vector<4x256xf32>, vector<8x256xf32> -> vector<8x256xf32>
    %36 = arith.addf %27, %35 : vector<8x256xf32>
    %c0_17 = arith.constant 0 : index
    %c1 = arith.constant 1 : index
    %37 = vector.load %arg4[%c0_17, %c1] : memref<8x290xf32, #tpu.memory_space<vmem>>, vector<4x256xf32>
    %c1_18 = arith.constant 1 : index
    %c0_19 = arith.constant 0 : index
    %c0_20 = arith.constant 0 : index
    %38 = vector.load %arg1[%c1_18, %c0_19, %c0_20] : memref<9x8x4xf32, #tpu.memory_space<vmem>>, vector<1x8x4xf32>
    %39 = vector.shape_cast %38 : vector<1x8x4xf32> to vector<8x4xf32>
    %cst_21 = arith.constant dense<0.000000e+00> : vector<8x256xf32>
    %40 = tpu.matmul %39, %37, %cst_21 {dimension_numbers = #tpu.dot_dimension_numbers<[1], [0], [0], [1], [0, 0, 1, 1], [], []>} : vector<8x4xf32>, vector<4x256xf32>, vector<8x256xf32> -> vector<8x256xf32>
    %41 = arith.addf %36, %40 : vector<8x256xf32>
    %c0_22 = arith.constant 0 : index
    %c2 = arith.constant 2 : index
    %42 = vector.load %arg4[%c0_22, %c2] : memref<8x290xf32, #tpu.memory_space<vmem>>, vector<4x256xf32>
    %cst_23 = arith.constant 0.000000e+00 : f32
    %43 = vector.shape_cast %24 : vector<1x256xi1> to vector<1x256xi1>
    %44 = vector.broadcast %43 : vector<1x256xi1> to vector<4x256xi1>
    %45 = vector.broadcast %cst_23 : f32 to vector<4x256xf32>
    %46 = arith.select %44, %42, %45 : vector<4x256xi1>, vector<4x256xf32>
    %c2_24 = arith.constant 2 : index
    %c0_25 = arith.constant 0 : index
    %c0_26 = arith.constant 0 : index
    %47 = vector.load %arg1[%c2_24, %c0_25, %c0_26] : memref<9x8x4xf32, #tpu.memory_space<vmem>>, vector<1x8x4xf32>
    %48 = vector.shape_cast %47 : vector<1x8x4xf32> to vector<8x4xf32>
    %cst_27 = arith.constant dense<0.000000e+00> : vector<8x256xf32>
    %49 = tpu.matmul %48, %46, %cst_27 {dimension_numbers = #tpu.dot_dimension_numbers<[1], [0], [0], [1], [0, 0, 1, 1], [], []>} : vector<8x4xf32>, vector<4x256xf32>, vector<8x256xf32> -> vector<8x256xf32>
    %50 = arith.addf %41, %49 : vector<8x256xf32>
    %c0_28 = arith.constant 0 : index
    %c16 = arith.constant 16 : index
    %51 = vector.load %arg4[%c0_28, %c16] : memref<8x290xf32, #tpu.memory_space<vmem>>, vector<4x256xf32>
    %cst_29 = arith.constant 0.000000e+00 : f32
    %52 = vector.shape_cast %22 : vector<1x256xi1> to vector<1x256xi1>
    %53 = vector.broadcast %52 : vector<1x256xi1> to vector<4x256xi1>
    %54 = vector.broadcast %cst_29 : f32 to vector<4x256xf32>
    %55 = arith.select %53, %51, %54 : vector<4x256xi1>, vector<4x256xf32>
    %c3 = arith.constant 3 : index
    %c0_30 = arith.constant 0 : index
    %c0_31 = arith.constant 0 : index
    %56 = vector.load %arg1[%c3, %c0_30, %c0_31] : memref<9x8x4xf32, #tpu.memory_space<vmem>>, vector<1x8x4xf32>
    %57 = vector.shape_cast %56 : vector<1x8x4xf32> to vector<8x4xf32>
    %cst_32 = arith.constant dense<0.000000e+00> : vector<8x256xf32>
    %58 = tpu.matmul %57, %55, %cst_32 {dimension_numbers = #tpu.dot_dimension_numbers<[1], [0], [0], [1], [0, 0, 1, 1], [], []>} : vector<8x4xf32>, vector<4x256xf32>, vector<8x256xf32> -> vector<8x256xf32>
    %59 = arith.addf %50, %58 : vector<8x256xf32>
    %c0_33 = arith.constant 0 : index
    %c17_34 = arith.constant 17 : index
    %60 = vector.load %arg4[%c0_33, %c17_34] : memref<8x290xf32, #tpu.memory_space<vmem>>, vector<4x256xf32>
    %c4 = arith.constant 4 : index
    %c0_35 = arith.constant 0 : index
    %c0_36 = arith.constant 0 : index
    %61 = vector.load %arg1[%c4, %c0_35, %c0_36] : memref<9x8x4xf32, #tpu.memory_space<vmem>>, vector<1x8x4xf32>
    %62 = vector.shape_cast %61 : vector<1x8x4xf32> to vector<8x4xf32>
    %cst_37 = arith.constant dense<0.000000e+00> : vector<8x256xf32>
    %63 = tpu.matmul %62, %60, %cst_37 {dimension_numbers = #tpu.dot_dimension_numbers<[1], [0], [0], [1], [0, 0, 1, 1], [], []>} : vector<8x4xf32>, vector<4x256xf32>, vector<8x256xf32> -> vector<8x256xf32>
    %64 = arith.addf %59, %63 : vector<8x256xf32>
    %c0_38 = arith.constant 0 : index
    %c18 = arith.constant 18 : index
    %65 = vector.load %arg4[%c0_38, %c18] : memref<8x290xf32, #tpu.memory_space<vmem>>, vector<4x256xf32>
    %cst_39 = arith.constant 0.000000e+00 : f32
    %66 = vector.shape_cast %24 : vector<1x256xi1> to vector<1x256xi1>
    %67 = vector.broadcast %66 : vector<1x256xi1> to vector<4x256xi1>
    %68 = vector.broadcast %cst_39 : f32 to vector<4x256xf32>
    %69 = arith.select %67, %65, %68 : vector<4x256xi1>, vector<4x256xf32>
    %c5 = arith.constant 5 : index
    %c0_40 = arith.constant 0 : index
    %c0_41 = arith.constant 0 : index
    %70 = vector.load %arg1[%c5, %c0_40, %c0_41] : memref<9x8x4xf32, #tpu.memory_space<vmem>>, vector<1x8x4xf32>
    %71 = vector.shape_cast %70 : vector<1x8x4xf32> to vector<8x4xf32>
    %cst_42 = arith.constant dense<0.000000e+00> : vector<8x256xf32>
    %72 = tpu.matmul %71, %69, %cst_42 {dimension_numbers = #tpu.dot_dimension_numbers<[1], [0], [0], [1], [0, 0, 1, 1], [], []>} : vector<8x4xf32>, vector<4x256xf32>, vector<8x256xf32> -> vector<8x256xf32>
    %73 = arith.addf %64, %72 : vector<8x256xf32>
    %c0_43 = arith.constant 0 : index
    %c32 = arith.constant 32 : index
    %74 = vector.load %arg4[%c0_43, %c32] : memref<8x290xf32, #tpu.memory_space<vmem>>, vector<4x256xf32>
    %cst_44 = arith.constant 0.000000e+00 : f32
    %75 = vector.shape_cast %22 : vector<1x256xi1> to vector<1x256xi1>
    %76 = vector.broadcast %75 : vector<1x256xi1> to vector<4x256xi1>
    %77 = vector.broadcast %cst_44 : f32 to vector<4x256xf32>
    %78 = arith.select %76, %74, %77 : vector<4x256xi1>, vector<4x256xf32>
    %c6 = arith.constant 6 : index
    %c0_45 = arith.constant 0 : index
    %c0_46 = arith.constant 0 : index
    %79 = vector.load %arg1[%c6, %c0_45, %c0_46] : memref<9x8x4xf32, #tpu.memory_space<vmem>>, vector<1x8x4xf32>
    %80 = vector.shape_cast %79 : vector<1x8x4xf32> to vector<8x4xf32>
    %cst_47 = arith.constant dense<0.000000e+00> : vector<8x256xf32>
    %81 = tpu.matmul %80, %78, %cst_47 {dimension_numbers = #tpu.dot_dimension_numbers<[1], [0], [0], [1], [0, 0, 1, 1], [], []>} : vector<8x4xf32>, vector<4x256xf32>, vector<8x256xf32> -> vector<8x256xf32>
    %82 = arith.addf %73, %81 : vector<8x256xf32>
    %c0_48 = arith.constant 0 : index
    %c33 = arith.constant 33 : index
    %83 = vector.load %arg4[%c0_48, %c33] : memref<8x290xf32, #tpu.memory_space<vmem>>, vector<4x256xf32>
    %c7 = arith.constant 7 : index
    %c0_49 = arith.constant 0 : index
    %c0_50 = arith.constant 0 : index
    %84 = vector.load %arg1[%c7, %c0_49, %c0_50] : memref<9x8x4xf32, #tpu.memory_space<vmem>>, vector<1x8x4xf32>
    %85 = vector.shape_cast %84 : vector<1x8x4xf32> to vector<8x4xf32>
    %cst_51 = arith.constant dense<0.000000e+00> : vector<8x256xf32>
    %86 = tpu.matmul %85, %83, %cst_51 {dimension_numbers = #tpu.dot_dimension_numbers<[1], [0], [0], [1], [0, 0, 1, 1], [], []>} : vector<8x4xf32>, vector<4x256xf32>, vector<8x256xf32> -> vector<8x256xf32>
    %87 = arith.addf %82, %86 : vector<8x256xf32>
    %c0_52 = arith.constant 0 : index
    %c34 = arith.constant 34 : index
    %88 = vector.load %arg4[%c0_52, %c34] : memref<8x290xf32, #tpu.memory_space<vmem>>, vector<4x256xf32>
    %cst_53 = arith.constant 0.000000e+00 : f32
    %89 = vector.shape_cast %24 : vector<1x256xi1> to vector<1x256xi1>
    %90 = vector.broadcast %89 : vector<1x256xi1> to vector<4x256xi1>
    %91 = vector.broadcast %cst_53 : f32 to vector<4x256xf32>
    %92 = arith.select %90, %88, %91 : vector<4x256xi1>, vector<4x256xf32>
    %c8 = arith.constant 8 : index
    %c0_54 = arith.constant 0 : index
    %c0_55 = arith.constant 0 : index
    %93 = vector.load %arg1[%c8, %c0_54, %c0_55] : memref<9x8x4xf32, #tpu.memory_space<vmem>>, vector<1x8x4xf32>
    %94 = vector.shape_cast %93 : vector<1x8x4xf32> to vector<8x4xf32>
    %cst_56 = arith.constant dense<0.000000e+00> : vector<8x256xf32>
    %95 = tpu.matmul %94, %92, %cst_56 {dimension_numbers = #tpu.dot_dimension_numbers<[1], [0], [0], [1], [0, 0, 1, 1], [], []>} : vector<8x4xf32>, vector<4x256xf32>, vector<8x256xf32> -> vector<8x256xf32>
    %96 = arith.addf %87, %95 : vector<8x256xf32>
    %c0_57 = arith.constant 0 : index
    %c0_58 = arith.constant 0 : index
    %97 = vector.load %arg3[%c0_57, %c0_58] : memref<16x256xf32, #tpu.memory_space<vmem>>, vector<8x256xf32>
    tpu.vector_store %arg3[%c0_57, %c0_58], %96 {strides = array<i32>} : memref<16x256xf32, #tpu.memory_space<vmem>>, vector<8x256xf32>,
    %c4_59 = arith.constant 4 : index
    %c0_60 = arith.constant 0 : index
    %98 = vector.load %arg4[%c4_59, %c0_60] : memref<8x290xf32, #tpu.memory_space<vmem>>, vector<4x256xf32>
    %cst_61 = arith.constant 0.000000e+00 : f32
    %99 = vector.shape_cast %22 : vector<1x256xi1> to vector<1x256xi1>
    %100 = vector.broadcast %99 : vector<1x256xi1> to vector<4x256xi1>
    %101 = vector.broadcast %cst_61 : f32 to vector<4x256xf32>
    %102 = arith.select %100, %98, %101 : vector<4x256xi1>, vector<4x256xf32>
    %c0_62 = arith.constant 0 : index
    %c0_63 = arith.constant 0 : index
    %c0_64 = arith.constant 0 : index
    %103 = vector.load %arg1[%c0_62, %c0_63, %c0_64] : memref<9x8x4xf32, #tpu.memory_space<vmem>>, vector<1x8x4xf32>
    %104 = vector.shape_cast %103 : vector<1x8x4xf32> to vector<8x4xf32>
    %cst_65 = arith.constant dense<0.000000e+00> : vector<8x256xf32>
    %105 = tpu.matmul %104, %102, %cst_65 {dimension_numbers = #tpu.dot_dimension_numbers<[1], [0], [0], [1], [0, 0, 1, 1], [], []>} : vector<8x4xf32>, vector<4x256xf32>, vector<8x256xf32> -> vector<8x256xf32>
    %106 = arith.addf %27, %105 : vector<8x256xf32>
    %c4_66 = arith.constant 4 : index
    %c1_67 = arith.constant 1 : index
    %107 = vector.load %arg4[%c4_66, %c1_67] : memref<8x290xf32, #tpu.memory_space<vmem>>, vector<4x256xf32>
    %c1_68 = arith.constant 1 : index
    %c0_69 = arith.constant 0 : index
    %c0_70 = arith.constant 0 : index
    %108 = vector.load %arg1[%c1_68, %c0_69, %c0_70] : memref<9x8x4xf32, #tpu.memory_space<vmem>>, vector<1x8x4xf32>
    %109 = vector.shape_cast %108 : vector<1x8x4xf32> to vector<8x4xf32>
    %cst_71 = arith.constant dense<0.000000e+00> : vector<8x256xf32>
    %110 = tpu.matmul %109, %107, %cst_71 {dimension_numbers = #tpu.dot_dimension_numbers<[1], [0], [0], [1], [0, 0, 1, 1], [], []>} : vector<8x4xf32>, vector<4x256xf32>, vector<8x256xf32> -> vector<8x256xf32>
    %111 = arith.addf %106, %110 : vector<8x256xf32>
    %c4_72 = arith.constant 4 : index
    %c2_73 = arith.constant 2 : index
    %112 = vector.load %arg4[%c4_72, %c2_73] : memref<8x290xf32, #tpu.memory_space<vmem>>, vector<4x256xf32>
    %cst_74 = arith.constant 0.000000e+00 : f32
    %113 = vector.shape_cast %24 : vector<1x256xi1> to vector<1x256xi1>
    %114 = vector.broadcast %113 : vector<1x256xi1> to vector<4x256xi1>
    %115 = vector.broadcast %cst_74 : f32 to vector<4x256xf32>
    %116 = arith.select %114, %112, %115 : vector<4x256xi1>, vector<4x256xf32>
    %c2_75 = arith.constant 2 : index
    %c0_76 = arith.constant 0 : index
    %c0_77 = arith.constant 0 : index
    %117 = vector.load %arg1[%c2_75, %c0_76, %c0_77] : memref<9x8x4xf32, #tpu.memory_space<vmem>>, vector<1x8x4xf32>
    %118 = vector.shape_cast %117 : vector<1x8x4xf32> to vector<8x4xf32>
    %cst_78 = arith.constant dense<0.000000e+00> : vector<8x256xf32>
    %119 = tpu.matmul %118, %116, %cst_78 {dimension_numbers = #tpu.dot_dimension_numbers<[1], [0], [0], [1], [0, 0, 1, 1], [], []>} : vector<8x4xf32>, vector<4x256xf32>, vector<8x256xf32> -> vector<8x256xf32>
    %120 = arith.addf %111, %119 : vector<8x256xf32>
    %c4_79 = arith.constant 4 : index
    %c16_80 = arith.constant 16 : index
    %121 = vector.load %arg4[%c4_79, %c16_80] : memref<8x290xf32, #tpu.memory_space<vmem>>, vector<4x256xf32>
    %cst_81 = arith.constant 0.000000e+00 : f32
    %122 = vector.shape_cast %22 : vector<1x256xi1> to vector<1x256xi1>
    %123 = vector.broadcast %122 : vector<1x256xi1> to vector<4x256xi1>
    %124 = vector.broadcast %cst_81 : f32 to vector<4x256xf32>
    %125 = arith.select %123, %121, %124 : vector<4x256xi1>, vector<4x256xf32>
    %c3_82 = arith.constant 3 : index
    %c0_83 = arith.constant 0 : index
    %c0_84 = arith.constant 0 : index
    %126 = vector.load %arg1[%c3_82, %c0_83, %c0_84] : memref<9x8x4xf32, #tpu.memory_space<vmem>>, vector<1x8x4xf32>
    %127 = vector.shape_cast %126 : vector<1x8x4xf32> to vector<8x4xf32>
    %cst_85 = arith.constant dense<0.000000e+00> : vector<8x256xf32>
    %128 = tpu.matmul %127, %125, %cst_85 {dimension_numbers = #tpu.dot_dimension_numbers<[1], [0], [0], [1], [0, 0, 1, 1], [], []>} : vector<8x4xf32>, vector<4x256xf32>, vector<8x256xf32> -> vector<8x256xf32>
    %129 = arith.addf %120, %128 : vector<8x256xf32>
    %c4_86 = arith.constant 4 : index
    %c17_87 = arith.constant 17 : index
    %130 = vector.load %arg4[%c4_86, %c17_87] : memref<8x290xf32, #tpu.memory_space<vmem>>, vector<4x256xf32>
    %c4_88 = arith.constant 4 : index
    %c0_89 = arith.constant 0 : index
    %c0_90 = arith.constant 0 : index
    %131 = vector.load %arg1[%c4_88, %c0_89, %c0_90] : memref<9x8x4xf32, #tpu.memory_space<vmem>>, vector<1x8x4xf32>
    %132 = vector.shape_cast %131 : vector<1x8x4xf32> to vector<8x4xf32>
    %cst_91 = arith.constant dense<0.000000e+00> : vector<8x256xf32>
    %133 = tpu.matmul %132, %130, %cst_91 {dimension_numbers = #tpu.dot_dimension_numbers<[1], [0], [0], [1], [0, 0, 1, 1], [], []>} : vector<8x4xf32>, vector<4x256xf32>, vector<8x256xf32> -> vector<8x256xf32>
    %134 = arith.addf %129, %133 : vector<8x256xf32>
    %c4_92 = arith.constant 4 : index
    %c18_93 = arith.constant 18 : index
    %135 = vector.load %arg4[%c4_92, %c18_93] : memref<8x290xf32, #tpu.memory_space<vmem>>, vector<4x256xf32>
    %cst_94 = arith.constant 0.000000e+00 : f32
    %136 = vector.shape_cast %24 : vector<1x256xi1> to vector<1x256xi1>
    %137 = vector.broadcast %136 : vector<1x256xi1> to vector<4x256xi1>
    %138 = vector.broadcast %cst_94 : f32 to vector<4x256xf32>
    %139 = arith.select %137, %135, %138 : vector<4x256xi1>, vector<4x256xf32>
    %c5_95 = arith.constant 5 : index
    %c0_96 = arith.constant 0 : index
    %c0_97 = arith.constant 0 : index
    %140 = vector.load %arg1[%c5_95, %c0_96, %c0_97] : memref<9x8x4xf32, #tpu.memory_space<vmem>>, vector<1x8x4xf32>
    %141 = vector.shape_cast %140 : vector<1x8x4xf32> to vector<8x4xf32>
    %cst_98 = arith.constant dense<0.000000e+00> : vector<8x256xf32>
    %142 = tpu.matmul %141, %139, %cst_98 {dimension_numbers = #tpu.dot_dimension_numbers<[1], [0], [0], [1], [0, 0, 1, 1], [], []>} : vector<8x4xf32>, vector<4x256xf32>, vector<8x256xf32> -> vector<8x256xf32>
    %143 = arith.addf %134, %142 : vector<8x256xf32>
    %c4_99 = arith.constant 4 : index
    %c32_100 = arith.constant 32 : index
    %144 = vector.load %arg4[%c4_99, %c32_100] : memref<8x290xf32, #tpu.memory_space<vmem>>, vector<4x256xf32>
    %cst_101 = arith.constant 0.000000e+00 : f32
    %145 = vector.shape_cast %22 : vector<1x256xi1> to vector<1x256xi1>
    %146 = vector.broadcast %145 : vector<1x256xi1> to vector<4x256xi1>
    %147 = vector.broadcast %cst_101 : f32 to vector<4x256xf32>
    %148 = arith.select %146, %144, %147 : vector<4x256xi1>, vector<4x256xf32>
    %c6_102 = arith.constant 6 : index
    %c0_103 = arith.constant 0 : index
    %c0_104 = arith.constant 0 : index
    %149 = vector.load %arg1[%c6_102, %c0_103, %c0_104] : memref<9x8x4xf32, #tpu.memory_space<vmem>>, vector<1x8x4xf32>
    %150 = vector.shape_cast %149 : vector<1x8x4xf32> to vector<8x4xf32>
    %cst_105 = arith.constant dense<0.000000e+00> : vector<8x256xf32>
    %151 = tpu.matmul %150, %148, %cst_105 {dimension_numbers = #tpu.dot_dimension_numbers<[1], [0], [0], [1], [0, 0, 1, 1], [], []>} : vector<8x4xf32>, vector<4x256xf32>, vector<8x256xf32> -> vector<8x256xf32>
    %152 = arith.addf %143, %151 : vector<8x256xf32>
    %c4_106 = arith.constant 4 : index
    %c33_107 = arith.constant 33 : index
    %153 = vector.load %arg4[%c4_106, %c33_107] : memref<8x290xf32, #tpu.memory_space<vmem>>, vector<4x256xf32>
    %c7_108 = arith.constant 7 : index
    %c0_109 = arith.constant 0 : index
    %c0_110 = arith.constant 0 : index
    %154 = vector.load %arg1[%c7_108, %c0_109, %c0_110] : memref<9x8x4xf32, #tpu.memory_space<vmem>>, vector<1x8x4xf32>
    %155 = vector.shape_cast %154 : vector<1x8x4xf32> to vector<8x4xf32>
    %cst_111 = arith.constant dense<0.000000e+00> : vector<8x256xf32>
    %156 = tpu.matmul %155, %153, %cst_111 {dimension_numbers = #tpu.dot_dimension_numbers<[1], [0], [0], [1], [0, 0, 1, 1], [], []>} : vector<8x4xf32>, vector<4x256xf32>, vector<8x256xf32> -> vector<8x256xf32>
    %157 = arith.addf %152, %156 : vector<8x256xf32>
    %c4_112 = arith.constant 4 : index
    %c34_113 = arith.constant 34 : index
    %158 = vector.load %arg4[%c4_112, %c34_113] : memref<8x290xf32, #tpu.memory_space<vmem>>, vector<4x256xf32>
    %cst_114 = arith.constant 0.000000e+00 : f32
    %159 = vector.shape_cast %24 : vector<1x256xi1> to vector<1x256xi1>
    %160 = vector.broadcast %159 : vector<1x256xi1> to vector<4x256xi1>
    %161 = vector.broadcast %cst_114 : f32 to vector<4x256xf32>
    %162 = arith.select %160, %158, %161 : vector<4x256xi1>, vector<4x256xf32>
    %c8_115 = arith.constant 8 : index
    %c0_116 = arith.constant 0 : index
    %c0_117 = arith.constant 0 : index
    %163 = vector.load %arg1[%c8_115, %c0_116, %c0_117] : memref<9x8x4xf32, #tpu.memory_space<vmem>>, vector<1x8x4xf32>
    %164 = vector.shape_cast %163 : vector<1x8x4xf32> to vector<8x4xf32>
    %cst_118 = arith.constant dense<0.000000e+00> : vector<8x256xf32>
    %165 = tpu.matmul %164, %162, %cst_118 {dimension_numbers = #tpu.dot_dimension_numbers<[1], [0], [0], [1], [0, 0, 1, 1], [], []>} : vector<8x4xf32>, vector<4x256xf32>, vector<8x256xf32> -> vector<8x256xf32>
    %166 = arith.addf %157, %165 : vector<8x256xf32>
    %c8_119 = arith.constant 8 : index
    %c0_120 = arith.constant 0 : index
    %167 = vector.load %arg3[%c8_119, %c0_120] : memref<16x256xf32, #tpu.memory_space<vmem>>, vector<8x256xf32>
    tpu.vector_store %arg3[%c8_119, %c0_120], %166 {strides = array<i32>} : memref<16x256xf32, #tpu.memory_space<vmem>>, vector<8x256xf32>,
    return
  }
}

</mosaic_0001>

<bundles_post_ra>
// kernel: dummy_mixin_forward.1
= control target key start
LH: loop header
LB: loop body
LE: loop exit
PB: predicated region body
PF: predicated region fallthrough
CT: control target
= control target key end

     0   :  { %vm16_vm0 = vcmask 277504   ;;  %v1899_v1 = vmov 0.0   ;;  %s1900_s14 = smov 17   ;;  %v35_v3 = vlaneseq  ;;  %vm31_vm1 = vcmask 1047688   ;;  %s1902_s17 = smov 126   ;;  %s2213_s0 = inlined_call_operand.vmem [shape: f32[8,256], index: 0, kind: input, shape index: {}]   ;;  %s2214_s1 = inlined_call_operand.vmem [shape: f32[9,8,4], index: 1, kind: input, shape index: {}]   ;;  %s2215_s2 = inlined_call_operand.vmem [shape: f32[8,1], index: 2, kind: input, shape index: {}]   ;;  %s2216_s3 = inlined_call_operand.vmem [shape: f32[16,256], index: 3, kind: output, shape index: {}]  }
   0x1   :  { %v18_v0 = vld [vmem:[%s2213_s0] sm:$0xff]  ;;  %14 = vst [vmem:[#allocation2] sm:$0xff] %v1899_v1  ;;  %17 = vst.msk [vmem:[#allocation2 + $0x10] sm:$0xff] %vm16_vm0, %v1899_v1  ;;  %156 = vmatprep.mubr.f32.mxu0 %v1899_v1  ;;  %1015 = vmatprep.mubr.f32.mxu1 %v1899_v1  ;;  %v19_v2 = vld [vmem:[%s2213_s0 + $0x8] sm:$0xff]  ;;  %vm26_vm2 = vcmask 138240   ;;  %s1901_s0 = smov 127  }
   0x2   :  { %22 = vrot.lane.b32.xlu0 %v18_v0, %s1900_s14  ;;  %v1940_v5 = vand.u32 127, %v35_v3  ;;  %vm85_vm5 = vcmask 1043456   ;;  %v80_v24 = vld [vmem:[%s2214_s1] sm:$0xff]  ;;  %vm81_vm6 = vcmask 31744   ;;  %s1903_s20 = smov 112   ;;  %s1904_s21 = smov 111  }
   0x3   :  { %s1905_s22 = smov 110   ;;  %s1906_s23 = smov 96   ;;  %v1909_v33 = vmov 0   ;;  %v66_v34 = vld [vmem:[%s2215_s2] sm:$0xff]  ;;  %vm272_vm7 = vcmask 1031168   ;;  %vm179_vm8 = vcmask 1039360  }
   0x4   :  { %v1943_v6 = vadd.s32 128, %v1940_v5  ;;  %v42_v10 = vand.u32 15, %v1940_v5  ;;  %s1907_s24 = smov 95   ;;  %s1908_s25 = smov 94   ;;  %1898 = vset.pattern.permute.xlu0 %v1909_v33  ;;  %vm369_vm9 = vcmask 916480   ;;  %v1784_v54 = vld [vmem:[%s2214_s1 + $0x8] sm:$0xff] }
   0x5   :  { %v1788_v3 = vld [vmem:[%s2214_s1 + $0x10] sm:$0xff]  ;;  %vm468_vm12 = vcmask 908288   ;;  %vm557_vm13 = vcmask 900096   ;;  %vm654_vm14 = vcmask 785408   ;;  %vm753_vm15 = vcmask 777216  }
   0x6   :  { %24 = vrot.lane.b32.xlu0 %v19_v2, %s1900_s14  ;;  %v49_v9 = vand.u32 15, %v1943_v6  ;;  %vm1959_vm4 = vcmp.ge.s32.totalorder %v42_v10, 1  ;;  %vm2040_vm11 = vcmp.le.s32.totalorder %v42_v10, 14  ;;  %vm842_vm0 = vcmask 769024  }
   0x8   :  { %vm1953_vm3 = vcmp.ge.s32.totalorder %v49_v9, 1  ;;  %vm2033_vm10 = vcmp.le.s32.totalorder %v49_v9, 14 }
  0x74   :  { %v23_v4 = vpop.permute.xlu0 %22 }
  0x75   :  { %32 = vst.msk [vmem:[#allocation2] sm:$0xff] %vm31_vm1, %v23_v4 }
  0x78   :  { %v25_v7 = vpop.permute.xlu0 %24 }
  0x79   :  { %v27_v8 = vsel %vm26_vm2, %v23_v4, %v25_v7  ;;  %34 = vst.msk [vmem:[#allocation2 + $0x10] sm:$0xff] %vm26_vm2, %v25_v7 }
  0x7a   :  { %33 = vst [vmem:[#allocation2 + $0x8] sm:$0xff] %v27_v8 }
  0x7c   :  { %v1947_v11 = vld [vmem:[#allocation2] sm:$0xf]  ;;  %v935_v14 = vld [vmem:[#allocation2] sm:$0xf0] }
  0x7d   :  { %173 = vrot.lane.b32.xlu0 %v1947_v11, %s1901_s0  ;;  %v72_v16 = vld [vmem:[#allocation2] sm:$0xf]  ;;  %v937_v21 = vsel %vm1959_vm4, %v935_v14, 0.0  ;;  %v1024_v30 = vld [vmem:[#allocation2] sm:$0xf0] }
  0x7e   :  { %v78_v22 = vsel %vm1959_vm4, %v72_v16, 0.0  ;;  %v942_v25 = vrot.slane %v937_v21, 4  ;;  %v1031_v32 = vrot.slane %v1024_v30, 4 }
  0x80   :  { %v1963_v15 = vld [vmem:[#allocation2 + $0x10] sm:$0xf]  ;;  %v1026_v27 = vld [vmem:[#allocation2 + $0x10] sm:$0xf0] }
  0x81   :  { %266 = vrot.lane.b32.xlu0 %v1947_v11, %s1902_s17  ;;  %177 = vrot.lane.b32.xlu1 %v1963_v15, %s1901_s0  ;;  %v73_v17 = vld [vmem:[#allocation2 + $0x8] sm:$0xf]  ;;  %v936_v18 = vld [vmem:[#allocation2 + $0x8] sm:$0xf0]  ;;  %v1033_v28 = vrot.slane %v1026_v27, 4 }
  0x82   :  { %v79_v19 = vsel %vm1953_vm3, %v73_v17, 0.0  ;;  %v938_v20 = vsel %vm1953_vm3, %v936_v18, 0.0  ;;  %v166_v26 = vld [vmem:[#allocation2 + $0x8] sm:$0xf]  ;;  %v1025_v29 = vld [vmem:[#allocation2 + $0x8] sm:$0xf0] }
  0x83   :  { %1781 = vmatprep.subr.msk.mxu0 %vm85_vm5, %v79_v19  ;;  %v943_v23 = vrot.slane %v938_v20, 4  ;;  %v1032_v31 = vrot.slane %v1025_v29, 4 }
  0x84   :  { %1782 = vmatpush1.msk.msra.mxu0 %vm85_vm5, %v78_v22 }
  0x85   :  { %363 = vrot.lane.b32.xlu0 %v1947_v11, %s1903_s20  ;;  %270 = vrot.lane.b32.xlu1 %v1963_v15, %s1902_s17 }
  0x86   :  { %1816 = vmatprep.subr.msk.mxu1 %vm85_vm5, %v943_v23  ;;  %1783 = vmatmul.mubr.msk.f32.vlgmr.msra.gmra.mrb[0].mxu0 %vm81_vm6, %v80_v24 }
  0x87   :  { %1817 = vmatpush1.msk.msra.mxu1 %vm85_vm5, %v942_v25  ;;  %253 = vmatprep.mubr.f32.mxu0 %v1899_v1 }
  0x88   :  { %1818 = vmatmul.mubr.msk.f32.vlgmr.msra.gmra.mrb[0].mxu1 %vm81_vm6, %v80_v24 }
  0x89   :  { %462 = vrot.lane.b32.xlu0 %v1947_v11, %s1904_s21  ;;  %367 = vrot.lane.b32.xlu1 %v1963_v15, %s1903_s20 }
  0x8a   :  { %1113 = vmatprep.mubr.f32.mxu1 %v1899_v1 }
  0x8d   :  { %466 = vrot.lane.b32.xlu1 %v1963_v15, %s1904_s21  ;;  %268 = vrot.lane.b32.xlu0 %v166_v26, %s1902_s17 }
  0x91   :  { %555 = vrot.lane.b32.xlu1 %v1963_v15, %s1905_s22  ;;  %365 = vrot.lane.b32.xlu0 %v166_v26, %s1903_s20 }
  0x95   :  { %464 = vrot.lane.b32.xlu0 %v166_v26, %s1904_s21  ;;  %175 = vrot.lane.b32.xlu1 %v166_v26, %s1901_s0 }
  0x99   :  { %553 = vrot.lane.b32.xlu0 %v166_v26, %s1905_s22  ;;  %1038 = vrot.lane.b32.xlu1 %v1033_v28, %s1901_s0 }
  0x9d   :  { %1036 = vrot.lane.b32.xlu0 %v1032_v31, %s1901_s0  ;;  %1034 = vrot.lane.b32.xlu1 %v1031_v32, %s1901_s0 }
  0xa1   :  { %1124 = vrot.lane.b32.xlu0 %v1032_v31, %s1902_s17  ;;  %1126 = vrot.lane.b32.xlu1 %v1033_v28, %s1902_s17 }
  0xa5   :  { %551 = vrot.lane.b32.xlu0 %v1947_v11, %s1905_s22  ;;  %1122 = vrot.lane.b32.xlu1 %v1031_v32, %s1902_s17 }
  0xa9   :  { %1219 = vrot.lane.b32.xlu0 %v1032_v31, %s1903_s20  ;;  %1221 = vrot.lane.b32.xlu1 %v1033_v28, %s1903_s20 }
  0xad   :  { %650 = vrot.lane.b32.xlu0 %v166_v26, %s1906_s23  ;;  %1217 = vrot.lane.b32.xlu1 %v1031_v32, %s1903_s20 }
  0xb1   :  { %648 = vrot.lane.b32.xlu0 %v1947_v11, %s1906_s23  ;;  %1317 = vrot.lane.b32.xlu1 %v1033_v28, %s1904_s21 }
  0xb5   :  { %1315 = vrot.lane.b32.xlu0 %v1032_v31, %s1904_s21  ;;  %1313 = vrot.lane.b32.xlu1 %v1031_v32, %s1904_s21 }
  0xb9   :  { %1403 = vrot.lane.b32.xlu0 %v1032_v31, %s1905_s22  ;;  %1405 = vrot.lane.b32.xlu1 %v1033_v28, %s1905_s22 }
  0xbd   :  { %749 = vrot.lane.b32.xlu0 %v166_v26, %s1907_s24  ;;  %1401 = vrot.lane.b32.xlu1 %v1031_v32, %s1905_s22 }
  0xc1   :  { %1498 = vrot.lane.b32.xlu0 %v1032_v31, %s1906_s23  ;;  %652 = vrot.lane.b32.xlu1 %v1963_v15, %s1906_s23 }
  0xc5   :  { %747 = vrot.lane.b32.xlu0 %v1947_v11, %s1907_s24  ;;  %1500 = vrot.lane.b32.xlu1 %v1033_v28, %s1906_s23 }
  0xc9   :  { %838 = vrot.lane.b32.xlu0 %v166_v26, %s1908_s25  ;;  %1496 = vrot.lane.b32.xlu1 %v1031_v32, %s1906_s23 }
  0xcd   :  { %1594 = vrot.lane.b32.xlu0 %v1032_v31, %s1907_s24  ;;  %751 = vrot.lane.b32.xlu1 %v1963_v15, %s1907_s24 }
  0xd1   :  { %1682 = vrot.lane.b32.xlu0 %v1032_v31, %s1908_s25  ;;  %1596 = vrot.lane.b32.xlu1 %v1033_v28, %s1907_s24 }
  0xd5   :  { %836 = vrot.lane.b32.xlu0 %v1947_v11, %s1908_s25  ;;  %1592 = vrot.lane.b32.xlu1 %v1031_v32, %s1907_s24 }
  0xd9   :  { %840 = vrot.lane.b32.xlu1 %v1963_v15, %s1908_s25  ;;  %69 = vperm.xlu0 %1898, %v66_v34   ;;  %v1792_v15 = vld [vmem:[%s2214_s1 + $0x18] sm:$0xff] }
  0xdd   :  { %1684 = vrot.lane.b32.xlu1 %v1033_v28, %s1908_s25  ;;  %v1796_v28 = vld [vmem:[%s2214_s1 + $0x20] sm:$0xff] }
  0xe1   :  { %1680 = vrot.lane.b32.xlu1 %v1031_v32, %s1908_s25 }
  0xef   :  { %v174_v35 = vpop.permute.xlu0 %173 }
  0xf3   :  { %v178_v36 = vpop.permute.xlu1 %177  ;;  %v267_v37 = vpop.permute.xlu0 %266 }
  0xf7   :  { %v271_v38 = vpop.permute.xlu1 %270  ;;  %v364_v39 = vpop.permute.xlu0 %363 }
  0xfb   :  { %v368_v40 = vpop.permute.xlu1 %367  ;;  %v463_v41 = vpop.permute.xlu0 %462 }
  0xff   :  { %v467_v42 = vpop.permute.xlu1 %466  ;;  %v269_v43 = vpop.permute.xlu0 %268 }
 0x100   :  { %v274_v47 = vsel %vm272_vm7, %v269_v43, %v271_v38  ;;  %v273_v51 = vsel %vm272_vm7, %v267_v37, %v269_v43  ;;  %v1800_v37 = vld [vmem:[%s2214_s1 + $0x28] sm:$0xff] }
 0x101   :  { %v278_v56 = vsel %vm2033_vm10, %v274_v47, 0.0  ;;  %v277_v57 = vsel %vm2040_vm11, %v273_v51, 0.0 }
 0x103   :  { %v556_v44 = vpop.permute.xlu1 %555  ;;  %v366_v45 = vpop.permute.xlu0 %365 }
 0x104   :  { %v371_v55 = vsel %vm369_vm9, %v366_v45, %v368_v40  ;;  %v370_v63 = vsel %vm369_vm9, %v364_v39, %v366_v45 }
 0x105   :  { %v375_v60 = vsel %vm1953_vm3, %v371_v55, 0.0  ;;  %v374_v4 = vsel %vm1959_vm4, %v370_v63, 0.0 }
 0x107   :  { %v176_v48 = vpop.permute.xlu1 %175  ;;  %v465_v49 = vpop.permute.xlu0 %464 }
 0x108   :  { %v180_v52 = vsel %vm179_vm8, %v174_v35, %v176_v48  ;;  %v181_v53 = vsel %vm179_vm8, %v176_v48, %v178_v36  ;;  %v470_v7 = vsel %vm468_vm12, %v465_v49, %v467_v42  ;;  %v469_v18 = vsel %vm468_vm12, %v463_v41, %v465_v49 }
 0x109   :  { %1785 = vmatprep.subr.msk.mxu0 %vm85_vm5, %v181_v53  ;;  %v1804_v53 = vld [vmem:[%s2214_s1 + $0x30] sm:$0xff] }
 0x10a   :  { %1786 = vmatpush1.msk.msra.mxu0 %vm85_vm5, %v180_v52 }
 0x10b   :  { %v1039_v58 = vpop.permute.xlu1 %1038  ;;  %1787 = vmatmul.mubr.msk.f32.vlgmr.msra.gmra.mrb[0].mxu0 %vm81_vm6, %v1784_v54  ;;  %1789 = vmatprep.subr.msk.mxu0 %vm85_vm5, %v278_v56  ;;  %v554_v59 = vpop.permute.xlu0 %553 }
 0x10c   :  { %1790 = vmatpush1.msk.msra.mxu0 %vm85_vm5, %v277_v57  ;;  %354 = vmatprep.mubr.f32.mxu0 %v1899_v1  ;;  %v559_v16 = vsel %vm557_vm13, %v554_v59, %v556_v44 }
 0x10d   :  { %1793 = vmatprep.subr.msk.mxu0 %vm85_vm5, %v375_v60  ;;  %v563_v21 = vsel %vm2033_vm10, %v559_v16, 0.0 }
 0x10f   :  { %v1035_v61 = vpop.permute.xlu1 %1034  ;;  %v1037_v62 = vpop.permute.xlu0 %1036 }
 0x110   :  { %v1040_v0 = vsel %vm179_vm8, %v1035_v61, %v1037_v62  ;;  %v1041_v2 = vsel %vm179_vm8, %v1037_v62, %v1039_v58 }
 0x111   :  { %1820 = vmatprep.subr.msk.mxu1 %vm85_vm5, %v1041_v2  ;;  %v1808_v2 = vld [vmem:[%s2214_s1 + $0x38] sm:$0xff] }
 0x112   :  { %1821 = vmatpush1.msk.msra.mxu1 %vm85_vm5, %v1040_v0 }
 0x113   :  { %v1127_v5 = vpop.permute.xlu1 %1126  ;;  %1791 = vmatmul.mubr.msk.f32.vlgmr.msra.gmra.mrb[0].mxu0 %vm81_vm6, %v1788_v3  ;;  %v1125_v6 = vpop.permute.xlu0 %1124  ;;  %1822 = vmatmul.mubr.msk.f32.vlgmr.msra.gmra.mrb[0].mxu1 %vm81_vm6, %v1784_v54 }
 0x114   :  { %1794 = vmatpush1.msk.msra.mxu0 %vm85_vm5, %v374_v4  ;;  %v1129_v8 = vsel %vm272_vm7, %v1125_v6, %v1127_v5  ;;  %451 = vmatprep.mubr.f32.mxu0 %v1899_v1 }
 0x115   :  { %v1133_v9 = vsel %vm2033_vm10, %v1129_v8, 0.0  ;;  %1797 = vmatprep.subr.msk.mxu0 %vm85_vm5, %v470_v7  ;;  %1208 = vmatprep.mubr.f32.mxu1 %v1899_v1 }
 0x116   :  { %1824 = vmatprep.subr.msk.mxu1 %vm85_vm5, %v1133_v9 }
 0x117   :  { %v1123_v10 = vpop.permute.xlu1 %1122  ;;  %v552_v11 = vpop.permute.xlu0 %551 }
 0x118   :  { %v1128_v14 = vsel %vm272_vm7, %v1123_v10, %v1125_v6  ;;  %v558_v26 = vsel %vm557_vm13, %v552_v11, %v554_v59 }
 0x119   :  { %v1132_v17 = vsel %vm2040_vm11, %v1128_v14, 0.0  ;;  %v562_v30 = vsel %vm2040_vm11, %v558_v26, 0.0 }
 0x11a   :  { %1825 = vmatpush1.msk.msra.mxu1 %vm85_vm5, %v1132_v17 }
 0x11b   :  { %v1222_v19 = vpop.permute.xlu1 %1221  ;;  %1795 = vmatmul.mubr.msk.f32.vlgmr.msra.gmra.mrb[0].mxu0 %vm81_vm6, %v1792_v15  ;;  %v1220_v20 = vpop.permute.xlu0 %1219  ;;  %1826 = vmatmul.mubr.msk.f32.vlgmr.msra.gmra.mrb[0].mxu1 %vm81_vm6, %v1788_v3 }
 0x11c   :  { %1798 = vmatpush1.msk.msra.mxu0 %vm85_vm5, %v469_v18  ;;  %v1224_v22 = vsel %vm369_vm9, %v1220_v20, %v1222_v19  ;;  %542 = vmatprep.mubr.f32.mxu0 %v1899_v1 }
 0x11d   :  { %v1228_v23 = vsel %vm1953_vm3, %v1224_v22, 0.0  ;;  %1801 = vmatprep.subr.msk.mxu0 %vm85_vm5, %v563_v21  ;;  %1303 = vmatprep.mubr.f32.mxu1 %v1899_v1 }
 0x11e   :  { %1828 = vmatprep.subr.msk.mxu1 %vm85_vm5, %v1228_v23 }
 0x11f   :  { %v1218_v24 = vpop.permute.xlu1 %1217  ;;  %v651_v25 = vpop.permute.xlu0 %650 }
 0x120   :  { %v1223_v27 = vsel %vm369_vm9, %v1218_v24, %v1220_v20 }
 0x121   :  { %v1227_v29 = vsel %vm1959_vm4, %v1223_v27, 0.0 }
 0x122   :  { %1829 = vmatpush1.msk.msra.mxu1 %vm85_vm5, %v1227_v29 }
 0x123   :  { %v1318_v31 = vpop.permute.xlu1 %1317  ;;  %1799 = vmatmul.mubr.msk.f32.vlgmr.msra.gmra.mrb[0].mxu0 %vm81_vm6, %v1796_v28  ;;  %v649_v32 = vpop.permute.xlu0 %648  ;;  %1830 = vmatmul.mubr.msk.f32.vlgmr.msra.gmra.mrb[0].mxu1 %vm81_vm6, %v1792_v15  ;;  %v1812_v15 = vld [vmem:[%s2214_s1 + $0x40] sm:$0xff] }
 0x124   :  { %1802 = vmatpush1.msk.msra.mxu0 %vm85_vm5, %v562_v30  ;;  %1392 = vmatprep.mubr.f32.mxu1 %v1899_v1  ;;  %v655_v47 = vsel %vm654_vm14, %v649_v32, %v651_v25 }
 0x125   :  { %639 = vmatprep.mubr.f32.mxu0 %v1899_v1  ;;  %v659_v54 = vsel %vm1959_vm4, %v655_v47, 0.0 }
 0x127   :  { %v1314_v33 = vpop.permute.xlu1 %1313  ;;  %v1316_v34 = vpop.permute.xlu0 %1315 }
 0x128   :  { %v1319_v35 = vsel %vm468_vm12, %v1314_v33, %v1316_v34  ;;  %v1320_v36 = vsel %vm468_vm12, %v1316_v34, %v1318_v31 }
 0x129   :  { %1832 = vmatprep.subr.msk.mxu1 %vm85_vm5, %v1320_v36 }
 0x12a   :  { %1833 = vmatpush1.msk.msra.mxu1 %vm85_vm5, %v1319_v35 }
 0x12b   :  { %v1406_v38 = vpop.permute.xlu1 %1405  ;;  %v1404_v39 = vpop.permute.xlu0 %1403  ;;  %1834 = vmatmul.mubr.msk.f32.vlgmr.msra.gmra.mrb[0].mxu1 %vm81_vm6, %v1796_v28  ;;  %1803 = vmatmul.mubr.msk.f32.vlgmr.msra.gmra.mrb[0].mxu0 %vm81_vm6, %v1800_v37 }
 0x12c   :  { %v1408_v40 = vsel %vm557_vm13, %v1404_v39, %v1406_v38  ;;  %1487 = vmatprep.mubr.f32.mxu1 %v1899_v1  ;;  %736 = vmatprep.mubr.f32.mxu0 %v1899_v1 }
 0x12d   :  { %v1412_v41 = vsel %vm2033_vm10, %v1408_v40, 0.0 }
 0x12e   :  { %1836 = vmatprep.subr.msk.mxu1 %vm85_vm5, %v1412_v41 }
 0x12f   :  { %v1402_v42 = vpop.permute.xlu1 %1401  ;;  %v750_v43 = vpop.permute.xlu0 %749 }
 0x130   :  { %v1407_v44 = vsel %vm557_vm13, %v1402_v42, %v1404_v39 }
 0x131   :  { %v1411_v45 = vsel %vm2040_vm11, %v1407_v44, 0.0 }
 0x132   :  { %1837 = vmatpush1.msk.msra.mxu1 %vm85_vm5, %v1411_v45 }
 0x133   :  { %v653_v48 = vpop.permute.xlu1 %652  ;;  %v1499_v49 = vpop.permute.xlu0 %1498  ;;  %1838 = vmatmul.mubr.msk.f32.vlgmr.msra.gmra.mrb[0].mxu1 %vm81_vm6, %v1800_v37 }
 0x134   :  { %v656_v51 = vsel %vm654_vm14, %v651_v25, %v653_v48  ;;  %1582 = vmatprep.mubr.f32.mxu1 %v1899_v1 }
 0x135   :  { %v660_v52 = vsel %vm1953_vm3, %v656_v51, 0.0 }
 0x136   :  { %1805 = vmatprep.subr.msk.mxu0 %vm85_vm5, %v660_v52 }
 0x137   :  { %v1501_v55 = vpop.permute.xlu1 %1500  ;;  %1806 = vmatpush1.msk.msra.mxu0 %vm85_vm5, %v659_v54  ;;  %v748_v56 = vpop.permute.xlu0 %747 }
 0x138   :  { %v1503_v57 = vsel %vm654_vm14, %v1499_v49, %v1501_v55  ;;  %1807 = vmatmul.mubr.msk.f32.vlgmr.msra.gmra.mrb[0].mxu0 %vm81_vm6, %v1804_v53  ;;  %v754_v3 = vsel %vm753_vm15, %v748_v56, %v750_v43 }
 0x139   :  { %v1507_v58 = vsel %vm1953_vm3, %v1503_v57, 0.0  ;;  %827 = vmatprep.mubr.f32.mxu0 %v1899_v1 }
 0x13a   :  { %1840 = vmatprep.subr.msk.mxu1 %vm85_vm5, %v1507_v58 }
 0x13b   :  { %v1497_v59 = vpop.permute.xlu1 %1496  ;;  %v839_v60 = vpop.permute.xlu0 %838 }
 0x13c   :  { %v1502_v61 = vsel %vm654_vm14, %v1497_v59, %v1499_v49 }
 0x13d   :  { %v1506_v62 = vsel %vm1959_vm4, %v1502_v61, 0.0 }
 0x13e   :  { %1841 = vmatpush1.msk.msra.mxu1 %vm85_vm5, %v1506_v62 }
 0x13f   :  { %v752_v63 = vpop.permute.xlu1 %751  ;;  %v1595_v0 = vpop.permute.xlu0 %1594  ;;  %1842 = vmatmul.mubr.msk.f32.vlgmr.msra.gmra.mrb[0].mxu1 %vm81_vm6, %v1804_v53 }
 0x140   :  { %v755_v12 = vsel %vm753_vm15, %v750_v43, %v752_v63  ;;  %1671 = vmatprep.mubr.f32.mxu1 %v1899_v1 }
 0x141   :  { %1809 = vmatprep.subr.msk.mxu0 %vm85_vm5, %v755_v12 }
 0x142   :  { %1810 = vmatpush1.msk.msra.mxu0 %vm85_vm5, %v754_v3 }
 0x143   :  { %v1597_v13 = vpop.permute.xlu1 %1596  ;;  %v1683_v4 = vpop.permute.xlu0 %1682  ;;  %1811 = vmatmul.mubr.msk.f32.vlgmr.msra.gmra.mrb[0].mxu0 %vm81_vm6, %v1808_v2 }
 0x144   :  { %v1599_v5 = vsel %vm753_vm15, %v1595_v0, %v1597_v13  ;;  %924 = vmatprep.mubr.f32.mxu0 %v1899_v1 }
 0x145   :  { %1844 = vmatprep.subr.msk.mxu1 %vm85_vm5, %v1599_v5 }
 0x147   :  { %v1593_v6 = vpop.permute.xlu1 %1592  ;;  %v837_v8 = vpop.permute.xlu0 %836 }
 0x148   :  { %v1598_v7 = vsel %vm753_vm15, %v1593_v6, %v1595_v0  ;;  %v843_v9 = vsel %vm842_vm0, %v837_v8, %v839_v60 }
 0x149   :  { %1845 = vmatpush1.msk.msra.mxu1 %vm85_vm5, %v1598_v7  ;;  %v847_v16 = vsel %vm2040_vm11, %v843_v9, 0.0 }
 0x14a   :  { %1846 = vmatmul.mubr.msk.f32.vlgmr.msra.gmra.mrb[0].mxu1 %vm81_vm6, %v1808_v2 }
 0x14b   :  { %v841_v10 = vpop.permute.xlu1 %840  ;;  %1766 = vmatprep.mubr.f32.mxu1 %v1899_v1 }
 0x14c   :  { %v844_v11 = vsel %vm842_vm0, %v839_v60, %v841_v10 }
 0x14d   :  { %v848_v14 = vsel %vm2033_vm10, %v844_v11, 0.0 }
 0x14e   :  { %1813 = vmatprep.subr.msk.mxu0 %vm85_vm5, %v848_v14 }
 0x14f   :  { %v1685_v17 = vpop.permute.xlu1 %1684  ;;  %1814 = vmatpush1.msk.msra.mxu0 %vm85_vm5, %v847_v16 }
 0x150   :  { %v1687_v18 = vsel %vm842_vm0, %v1683_v4, %v1685_v17  ;;  %1815 = vmatmul.mubr.msk.f32.vlgmr.msra.gmra.mrb[0].mxu0 %vm81_vm6, %v1812_v15 }
 0x151   :  { %v1691_v1 = vsel %vm2033_vm10, %v1687_v18, 0.0 }
 0x152   :  { %1848 = vmatprep.subr.msk.mxu1 %vm85_vm5, %v1691_v1 }
 0x153   :  { %v1681_v19 = vpop.permute.xlu1 %1680 }
 0x154   :  { %v1686_v20 = vsel %vm842_vm0, %v1681_v19, %v1683_v4 }
 0x155   :  { %v1690_v21 = vsel %vm2040_vm11, %v1686_v20, 0.0 }
 0x156   :  { %1849 = vmatpush1.msk.msra.mxu1 %vm85_vm5, %v1690_v21 }
 0x157   :  { %1850 = vmatmul.mubr.msk.f32.vlgmr.msra.gmra.mrb[0].mxu1 %vm81_vm6, %v1812_v15 }
 0x158   :  { %v70_v22 = vpop.permute.xlu0 %69 }
 0x223   :  { %v926_v23 = vpop.f32.mrb[0].mxu0 }
 0x224   :  { %v1851_v24 = vadd.f32 %v926_v23, %v70_v22  ;;  %v928_v25 = vpop.f32.mrb[1].mxu0 }
 0x225   :  { %v1852_v26 = vadd.f32 %v928_v25, %v70_v22 }
 0x226   :  { %933 = vst [vmem:[%s2216_s3] sm:$0xff] %v1851_v24 }
 0x227   :  { %934 = vst [vmem:[%s2216_s3 + $0x8] sm:$0xff] %v1852_v26 }
 0x22a   :  { %v1768_v46 = vpop.f32.mrb[0].mxu1 }
 0x22b   :  { %v1853_v50 = vadd.f32 %v1768_v46, %v70_v22  ;;  %v1770_v27 = vpop.f32.mrb[1].mxu1 }
 0x22c   :  { %v1854_v28 = vadd.f32 %v1770_v27, %v70_v22 }
 0x22d   :  { %1775 = vst [vmem:[%s2216_s3 + $0x10] sm:$0xff] %v1853_v50 }
 0x22e   :  { %1776 = vst [vmem:[%s2216_s3 + $0x18] sm:$0xff] %v1854_v28 }

</bundles_post_ra>
